<compile_context>
chip_gen: v7x
topology: tpu7x:2x2x1
jax: 0.10.0
libtpu: 0.0.40
codegen_flags: <defaults>
</compile_context>

<pallas_src>
import functools

import jax
import jax.numpy as jnp
from jax.experimental import pallas as pl
from jax.experimental.pallas import tpu as pltpu


_VMEM = pl.BlockSpec(memory_space=pltpu.MemorySpace.VMEM)
_VMEM_LIMIT = 48 * 1024 * 1024  # stays under v7x's 64 MiB physical VMEM
_EPS = 1e-5


# ----------------------------------------------------------------------------
# In-kernel helpers (operate on loaded values)
# ----------------------------------------------------------------------------
def _dot_bf16(a, b):
    """MXU matmul with bf16 inputs and f32 accumulation."""
    return jnp.dot(a.astype(jnp.bfloat16), b.astype(jnp.bfloat16),
                   preferred_element_type=jnp.float32)


def _apply_act(y, activation):
    if activation == "relu":
        return jnp.maximum(y, 0.0)
    return y


def _ln_val(z, g, b, eps):
    """LayerNorm over the last axis (biased variance, like torch), f32."""
    mu = jnp.mean(z, axis=-1, keepdims=True)
    d = z - mu
    var = jnp.mean(d * d, axis=-1, keepdims=True)
    return d * jax.lax.rsqrt(var + eps) * g + b


def _softmax_rows(s):
    m = jnp.max(s, axis=-1, keepdims=True)
    p = jnp.exp(s - m)
    denom = jnp.sum(p, axis=-1, keepdims=True)
    return p * pl.reciprocal(denom, approx=True)


def _mha_core(q_all, k_all, v_all, wo, nheads, scale):
    """Packed-head attention, out-proj as ONE full-depth matmul.

    q_all [Lq, E], k_all/v_all [Lk, E] (f32), wo [E, E] (bf16) -> [Lq, E] f32.
    Heads are static lane slices of the bf16-cast q/k/v; the per-head outputs
    are concatenated once and multiplied by Wo in a single MXU call.
    """
    _, E = q_all.shape
    Dh = E // nheads
    qb = q_all.astype(jnp.bfloat16)
    kb = k_all.astype(jnp.bfloat16)
    vb = v_all.astype(jnp.bfloat16)
    outs = []
    for h in range(nheads):
        sl = slice(h * Dh, (h + 1) * Dh)
        s = jax.lax.dot_general(qb[:, sl], kb[:, sl], (((1,), (1,)), ((), ())),
                                preferred_element_type=jnp.float32) * scale
        p = _softmax_rows(s)
        outs.append(jnp.dot(p.astype(jnp.bfloat16), vb[:, sl],
                            preferred_element_type=jnp.float32))
    attn = jnp.concatenate(outs, axis=-1)          # [Lq, E] f32
    return _dot_bf16(attn, wo)


# ----------------------------------------------------------------------------
# Tiled linear (+ optional fused add), grid over M marked "parallel"
# ----------------------------------------------------------------------------
def _linear_kernel(x_ref, w_ref, b_ref, o_ref, *, activation):
    y = _dot_bf16(x_ref[...], w_ref[...]) + b_ref[...]
    o_ref[...] = _apply_act(y, activation).astype(o_ref.dtype)


def _linear_add_kernel(x_ref, w_ref, b_ref, a_ref, o_ref, *, activation):
    y = _dot_bf16(x_ref[...], w_ref[...]) + b_ref[...] + a_ref[...]
    o_ref[...] = _apply_act(y, activation).astype(o_ref.dtype)


def linear(x, w, b, activation="none", add=None, tile_m=512):
    """y = act(x @ w + b [+ add]); x [M, K], w [K, N] (bf16) -> [M, N]."""
    M, K = x.shape
    N = w.shape[1]
    bm = M if M <= tile_m else tile_m
    grid = (pl.cdiv(M, bm),)
    in_specs = [
        pl.BlockSpec((bm, K), lambda i: (i, 0)),
        pl.BlockSpec((K, N), lambda i: (0, 0)),
        pl.BlockSpec((1, N), lambda i: (0, 0)),
    ]
    args = [x, w, b.reshape(1, N)]
    if add is not None:
        in_specs.append(pl.BlockSpec((bm, N), lambda i: (i, 0)))
        args.append(add)
        kern = functools.partial(_linear_add_kernel, activation=activation)
    else:
        kern = functools.partial(_linear_kernel, activation=activation)
    return pl.pallas_call(
        kern,
        out_shape=jax.ShapeDtypeStruct((M, N), x.dtype),
        grid=grid,
        in_specs=in_specs,
        out_specs=pl.BlockSpec((bm, N), lambda i: (i, 0)),
        compiler_params=pltpu.CompilerParams(
            dimension_semantics=("parallel",),
            vmem_limit_bytes=_VMEM_LIMIT),
    )(*args)


# ----------------------------------------------------------------------------
# Fused encoder layer (post-norm, relu FFN), tiled over the token axis.
# Optionally fuses the nn.Transformer encoder-final LayerNorm (last layer).
# ----------------------------------------------------------------------------
def _encoder_layer_kernel(xt_ref, xf_ref,
                          wq_ref, bq_ref, wkv_ref, bkv_ref, wo_ref, bo_ref,
                          ln1_g_ref, ln1_b_ref,
                          w1_ref, b1_ref, w2_ref, b2_ref,
                          ln2_g_ref, ln2_b_ref,
                          fin_g_ref, fin_b_ref,
                          out_ref, *, nheads, eps, final_ln):
    x = xt_ref[...].astype(jnp.float32)            # [tq, E]  q-tile
    xf = xf_ref[...].astype(jnp.float32)           # [L,  E]  full src (K/V)
    E = x.shape[1]
    Dh = E // nheads
    scale = 1.0 / float(Dh) ** 0.5

    # Self attention (q from the tile, k/v from the full sequence).
    q = _dot_bf16(x, wq_ref[...]) + bq_ref[...]               # [tq, E]
    kv = _dot_bf16(xf, wkv_ref[...]) + bkv_ref[...]           # [L, 2E]
    attn = _mha_core(q, kv[:, :E], kv[:, E:], wo_ref[...],
                     nheads, scale) + bo_ref[...]
    z = _ln_val(x + attn, ln1_g_ref[...], ln1_b_ref[...], eps)

    # FFN
    ff = jnp.maximum(_dot_bf16(z, w1_ref[...]) + b1_ref[...], 0.0)
    ff = _dot_bf16(ff, w2_ref[...]) + b2_ref[...]
    y = _ln_val(z + ff, ln2_g_ref[...], ln2_b_ref[...], eps)
    if final_ln:
        y = _ln_val(y, fin_g_ref[...], fin_b_ref[...], eps)
    out_ref[...] = y.astype(out_ref.dtype)


def encoder_layer(src, p, fin_g, fin_b, nheads, final_ln, tq_max=256):
    L, E = src.shape
    F = p["w1"].shape[1]
    tq = L if L <= tq_max else tq_max
    if tq < L:
        tq = max(8, (tq // 8) * 8)                 # (8,128) tiling rule
    grid = (pl.cdiv(L, tq),)

    def const(shape):
        return pl.BlockSpec(shape, lambda i: (0, 0))

    in_specs = [
        pl.BlockSpec((tq, E), lambda i: (i, 0)),   # src q-tile
        const((L, E)),                             # full src (VMEM-resident)
        const((E, E)), const((1, E)),              # wq, bq
        const((E, 2 * E)), const((1, 2 * E)),      # wkv, bkv
        const((E, E)), const((1, E)),              # wo, bo
        const((1, E)), const((1, E)),              # ln1
        const((E, F)), const((1, F)),              # w1, b1
        const((F, E)), const((1, E)),              # w2, b2
        const((1, E)), const((1, E)),              # ln2
        const((1, E)), const((1, E)),              # fused final LN params
    ]
    args = [
        src, src,
        p["wq"], p["bq"].reshape(1, E),
        p["wkv"], p["bkv"].reshape(1, 2 * E),
        p["wo"], p["bo"].reshape(1, E),
        p["ln1_g"].reshape(1, E), p["ln1_b"].reshape(1, E),
        p["w1"], p["b1"].reshape(1, F),
        p["w2"], p["b2"].reshape(1, E),
        p["ln2_g"].reshape(1, E), p["ln2_b"].reshape(1, E),
        fin_g.reshape(1, E), fin_b.reshape(1, E),
    ]
    return pl.pallas_call(
        functools.partial(_encoder_layer_kernel, nheads=nheads, eps=_EPS,
                          final_ln=final_ln),
        out_shape=jax.ShapeDtypeStruct((L, E), src.dtype),
        grid=grid,
        in_specs=in_specs,
        out_specs=pl.BlockSpec((tq, E), lambda i: (i, 0)),
        compiler_params=pltpu.CompilerParams(
            dimension_semantics=("parallel",),
            vmem_limit_bytes=_VMEM_LIMIT),
    )(*args)


# ----------------------------------------------------------------------------
# Fused decoder layer (self-attn -> LN -> cross-attn -> LN -> FFN -> LN)
# Lt = 100 queries is tiny, so the whole layer stays VMEM-resident.
# ----------------------------------------------------------------------------
def _decoder_layer_kernel(tgt_ref, mem_ref,
                          s_wqkv_ref, s_bqkv_ref, s_wo_ref, s_bo_ref,
                          ln1_g_ref, ln1_b_ref,
                          c_wq_ref, c_bq_ref, c_wkv_ref, c_bkv_ref,
                          c_wo_ref, c_bo_ref,
                          ln2_g_ref, ln2_b_ref,
                          w1_ref, b1_ref, w2_ref, b2_ref,
                          ln3_g_ref, ln3_b_ref,
                          out_ref, *, nheads, eps):
    x = tgt_ref[...].astype(jnp.float32)                         # [Lt, E]
    mem = mem_ref[...].astype(jnp.float32)                       # [Lm, E]
    E = x.shape[1]
    Dh = E // nheads
    scale = 1.0 / float(Dh) ** 0.5

    # Self attention
    qkv = _dot_bf16(x, s_wqkv_ref[...]) + s_bqkv_ref[...]
    a = _mha_core(qkv[:, :E], qkv[:, E:2 * E], qkv[:, 2 * E:],
                  s_wo_ref[...], nheads, scale) + s_bo_ref[...]
    x = _ln_val(x + a, ln1_g_ref[...], ln1_b_ref[...], eps)

    # Cross attention (q from tgt, fused k/v from memory)
    q = _dot_bf16(x, c_wq_ref[...]) + c_bq_ref[...]
    kv = _dot_bf16(mem, c_wkv_ref[...]) + c_bkv_ref[...]
    a = _mha_core(q, kv[:, :E], kv[:, E:],
                  c_wo_ref[...], nheads, scale) + c_bo_ref[...]
    x = _ln_val(x + a, ln2_g_ref[...], ln2_b_ref[...], eps)

    # FFN
    ff = jnp.maximum(_dot_bf16(x, w1_ref[...]) + b1_ref[...], 0.0)
    ff = _dot_bf16(ff, w2_ref[...]) + b2_ref[...]
    out_ref[...] = _ln_val(x + ff, ln3_g_ref[...], ln3_b_ref[...],
                           eps).astype(out_ref.dtype)


def decoder_layer(tgt, memory, p, nheads):
    Lt, E = tgt.shape
    F = p["w1"].shape[1]
    args = [
        tgt, memory,
        p["s_wqkv"], p["s_bqkv"].reshape(1, 3 * E),
        p["s_wo"], p["s_bo"].reshape(1, E),
        p["ln1_g"].reshape(1, E), p["ln1_b"].reshape(1, E),
        p["c_wq"], p["c_bq"].reshape(1, E),
        p["c_wkv"], p["c_bkv"].reshape(1, 2 * E),
        p["c_wo"], p["c_bo"].reshape(1, E),
        p["ln2_g"].reshape(1, E), p["ln2_b"].reshape(1, E),
        p["w1"], p["b1"].reshape(1, F), p["w2"], p["b2"].reshape(1, E),
        p["ln3_g"].reshape(1, E), p["ln3_b"].reshape(1, E),
    ]
    return pl.pallas_call(
        functools.partial(_decoder_layer_kernel, nheads=nheads, eps=_EPS),
        out_shape=jax.ShapeDtypeStruct((Lt, E), tgt.dtype),
        in_specs=[_VMEM] * len(args),
        out_specs=_VMEM,
        compiler_params=pltpu.CompilerParams(vmem_limit_bytes=_VMEM_LIMIT),
    )(*args)


# ----------------------------------------------------------------------------
# Fused decoder-final LayerNorm + (class, bbox) heads, lane-dense padded out
# ----------------------------------------------------------------------------
def _ln_heads_kernel(x_ref, g_ref, b_ref, w_ref, bh_ref, o_ref, *, n_cls, eps):
    x = x_ref[...].astype(jnp.float32)
    z = _ln_val(x, g_ref[...], b_ref[...], eps)
    y = _dot_bf16(z, w_ref[...]) + bh_ref[...]
    col = jax.lax.broadcasted_iota(jnp.int32, y.shape, 1)
    is_box = jnp.logical_and(col >= n_cls, col < n_cls + 4)
    y = jnp.where(is_box, jax.nn.sigmoid(y), y)
    o_ref[...] = y.astype(o_ref.dtype)


def ln_heads(hs, gamma, beta, w_heads, b_heads, n_cls):
    M, E = hs.shape
    N = w_heads.shape[1]
    return pl.pallas_call(
        functools.partial(_ln_heads_kernel, n_cls=n_cls, eps=_EPS),
        out_shape=jax.ShapeDtypeStruct((M, N), hs.dtype),
        in_specs=[_VMEM] * 5,
        out_specs=_VMEM,
        compiler_params=pltpu.CompilerParams(vmem_limit_bytes=_VMEM_LIMIT),
    )(hs, gamma.reshape(1, E), beta.reshape(1, E), w_heads,
      b_heads.reshape(1, N))


# ----------------------------------------------------------------------------
# DETR forward (post-backbone)
# ----------------------------------------------------------------------------
def detr_forward(x, params, cfg):
    """x: backbone feature map, NCHW, batch must be 1."""
    B, C, H, W = x.shape
    assert B == 1, "nn.Transformer path of DETR (query_pos.unsqueeze(1)) implies batch=1"
    E = cfg["hidden_dim"]
    n_cls = cfg["num_classes"] + 1

    # NCHW feature map -> [HW, C], matching h.flatten(2).permute(2, 0, 1).
    x2 = jnp.transpose(x[0], (1, 2, 0)).reshape(H * W, C)

    # Positional embedding (glue): cat([col (H,W,E/2), row (H,W,E/2)], -1).
    half = E // 2
    col = params["col_embed"][:W]
    row = params["row_embed"][:H]
    pos = jnp.concatenate(
        [jnp.broadcast_to(col[None, :, :], (H, W, half)),
         jnp.broadcast_to(row[:, None, :], (H, W, half))],
        axis=-1,
    ).reshape(H * W, E)

    # 1x1 conv == per-pixel matmul; positional-embedding add fused in.
    src = linear(x2, params["conv_w"], params["conv_b"], add=pos)  # [HW, E]

    # Encoder; the nn.Transformer encoder-final LayerNorm is fused into the
    # last layer's kernel.
    n_enc = len(params["enc_layers"])
    for li, lp in enumerate(params["enc_layers"]):
        src = encoder_layer(src, lp, params["enc_norm_g"], params["enc_norm_b"],
                            cfg["nheads"], final_ln=(li == n_enc - 1),
                            tq_max=cfg.get("enc_tile", 256))
    memory = src

    # Decoder (+ final LayerNorm fused with the output heads).
    tgt = params["query_pos"]                                      # [100, E]
    for lp in params["dec_layers"]:
        tgt = decoder_layer(tgt, memory, lp, cfg["nheads"])

    y = ln_heads(tgt, params["dec_norm_g"], params["dec_norm_b"],
                 params["heads_w"], params["heads_b"], n_cls)      # [100, pad]
    logits = y[:, :n_cls]
    boxes = y[:, n_cls:n_cls + 4]
    return logits, boxes


# ----------------------------------------------------------------------------
# Deterministic parameter initialization (weights stored in bf16 for the MXU)
# ----------------------------------------------------------------------------
def _key_iter(key):
    while True:
        key, sub = jax.random.split(key)
        yield sub


def _bf16(w):
    return w.astype(jnp.bfloat16)


def _init_linear(kit, fan_in, fan_out):
    w = jax.random.normal(next(kit), (fan_in, fan_out), jnp.float32) / jnp.sqrt(fan_in)
    b = jax.random.normal(next(kit), (fan_out,), jnp.float32) * 0.01
    return w, b


def _ones(E):
    return jnp.ones((E,), jnp.float32)


def _zeros(E):
    return jnp.zeros((E,), jnp.float32)


def _init_enc_layer(kit, E, F):
    wq, bq = _init_linear(kit, E, E)
    wk, bk = _init_linear(kit, E, E)
    wv, bv = _init_linear(kit, E, E)
    wo, bo = _init_linear(kit, E, E)
    w1, b1 = _init_linear(kit, E, F)
    w2, b2 = _init_linear(kit, F, E)
    return dict(
        wq=_bf16(wq), bq=bq,
        wkv=_bf16(jnp.concatenate([wk, wv], axis=1)),
        bkv=jnp.concatenate([bk, bv]),
        wo=_bf16(wo), bo=bo,
        ln1_g=_ones(E), ln1_b=_zeros(E),
        w1=_bf16(w1), b1=b1, w2=_bf16(w2), b2=b2,
        ln2_g=_ones(E), ln2_b=_zeros(E))


def _init_dec_layer(kit, E, F):
    wq, bq = _init_linear(kit, E, E)
    wk, bk = _init_linear(kit, E, E)
    wv, bv = _init_linear(kit, E, E)
    wo, bo = _init_linear(kit, E, E)
    cwq, cbq = _init_linear(kit, E, E)
    cwk, cbk = _init_linear(kit, E, E)
    cwv, cbv = _init_linear(kit, E, E)
    cwo, cbo = _init_linear(kit, E, E)
    w1, b1 = _init_linear(kit, E, F)
    w2, b2 = _init_linear(kit, F, E)
    return dict(
        s_wqkv=_bf16(jnp.concatenate([wq, wk, wv], axis=1)),
        s_bqkv=jnp.concatenate([bq, bk, bv]),
        s_wo=_bf16(wo), s_bo=bo,
        ln1_g=_ones(E), ln1_b=_zeros(E),
        c_wq=_bf16(cwq), c_bq=cbq,
        c_wkv=_bf16(jnp.concatenate([cwk, cwv], axis=1)),
        c_bkv=jnp.concatenate([cbk, cbv]),
        c_wo=_bf16(cwo), c_bo=cbo,
        ln2_g=_ones(E), ln2_b=_zeros(E),
        w1=_bf16(w1), b1=b1, w2=_bf16(w2), b2=b2,
        ln3_g=_ones(E), ln3_b=_zeros(E))


def init_params(key, cfg):
    kit = _key_iter(key)
    E = cfg["hidden_dim"]
    n_cls = cfg["num_classes"] + 1
    conv_w, conv_b = _init_linear(kit, cfg["backbone_channels"], E)
    cls_w, cls_b = _init_linear(kit, E, n_cls)
    bbox_w, bbox_b = _init_linear(kit, E, 4)

    # Fuse class + bbox heads into one lane-dense (>=128 wide) matmul.
    n_out = n_cls + 4
    n_pad = max(128, ((n_out + 127) // 128) * 128)
    heads_w = jnp.zeros((E, n_pad), jnp.float32)
    heads_w = heads_w.at[:, :n_cls].set(cls_w).at[:, n_cls:n_cls + 4].set(bbox_w)
    heads_b = jnp.zeros((n_pad,), jnp.float32)
    heads_b = heads_b.at[:n_cls].set(cls_b).at[n_cls:n_cls + 4].set(bbox_b)

    return dict(
        conv_w=_bf16(conv_w), conv_b=conv_b,
        query_pos=jax.random.uniform(next(kit), (100, E), jnp.float32),
        row_embed=jax.random.uniform(next(kit), (50, E // 2), jnp.float32),
        col_embed=jax.random.uniform(next(kit), (50, E // 2), jnp.float32),
        enc_layers=[_init_enc_layer(kit, E, cfg["ff_dim"])
                    for _ in range(cfg["num_encoder_layers"])],
        enc_norm_g=_ones(E), enc_norm_b=_zeros(E),
        dec_layers=[_init_dec_layer(kit, E, cfg["ff_dim"])
                    for _ in range(cfg["num_decoder_layers"])],
        dec_norm_g=_ones(E), dec_norm_b=_zeros(E),
        heads_w=_bf16(heads_w), heads_b=heads_b,
    )


# ----------------------------------------------------------------------------
if __name__ == "__main__":
    # Small demo config (correctness smoke test; real DETR uses E=256, F=2048,
    # 2048 backbone channels, 6+6 layers — same kernels, just bigger shapes).
    cfg = dict(
        num_classes=10,
        hidden_dim=32,
        nheads=4,
        num_encoder_layers=2,
        num_decoder_layers=2,
        ff_dim=64,
        backbone_channels=64,
        enc_tile=32,          # exercises the token-axis grid (L=64 -> grid=2)
    )
    key = jax.random.PRNGKey(0)
    k_x, k_p = jax.random.split(key)

    # Synthetic backbone feature map (stand-in for resnet50(...) output), NCHW.
    x = jax.random.normal(k_x, (1, cfg["backbone_channels"], 8, 8), jnp.float32)
    params = init_params(k_p, cfg)

    logits, boxes = detr_forward(x, params, cfg)
    jax.block_until_ready((logits, boxes))

    assert logits.shape == (100, cfg["num_classes"] + 1)
    assert boxes.shape == (100, 4)
    assert bool(jnp.all(jnp.isfinite(logits))) and bool(jnp.all(jnp.isfinite(boxes)))
    assert bool(jnp.all(boxes >= 0.0)) and bool(jnp.all(boxes <= 1.0))
    print("KERNEL_OK")
</pallas_src>

<mosaic_0001>
module attributes {stable_mosaic.version = 11 : i64} {
  func.func @_linear_add_kernel(%arg0: i32, %arg1: memref<64x64xf32, #tpu.memory_space<vmem>>, %arg2: memref<64x32xbf16, #tpu.memory_space<vmem>>, %arg3: memref<1x32xf32, #tpu.memory_space<vmem>>, %arg4: memref<64x32xf32, #tpu.memory_space<vmem>>, %arg5: memref<64x32xf32, #tpu.memory_space<vmem>>) attributes {dimension_semantics = [#tpu.dimension_semantics<parallel>], iteration_bounds = array<i64: 1>, scalar_prefetch = 0 : i64, scratch_operands = 0 : i64, tpu.core_type = #tpu.core_type<tc>, window_params = [{transform_indices = @transform_0, window_bounds = array<i64: 64, 64>}, {pipeline_mode = #tpu.pipeline_mode<synchronous>, transform_indices = @transform_1, window_bounds = array<i64: 64, 32>}, {pipeline_mode = #tpu.pipeline_mode<synchronous>, transform_indices = @transform_2, window_bounds = array<i64: 1, 32>}, {transform_indices = @transform_3, window_bounds = array<i64: 64, 32>}, {transform_indices = @transform_4, window_bounds = array<i64: 64, 32>}]} {
    %c0 = arith.constant 0 : index
    %c0_0 = arith.constant 0 : index
    %0 = vector.load %arg1[%c0, %c0_0] : memref<64x64xf32, #tpu.memory_space<vmem>>, vector<64x64xf32>
    %c0_1 = arith.constant 0 : index
    %c0_2 = arith.constant 0 : index
    %1 = vector.load %arg2[%c0_1, %c0_2] : memref<64x32xbf16, #tpu.memory_space<vmem>>, vector<64x32xbf16>
    %2 = arith.truncf %0 : vector<64x64xf32> to vector<64x64xbf16>
    %cst = arith.constant dense<0.000000e+00> : vector<64x32xf32>
    %3 = tpu.matmul %2, %1, %cst {dimension_numbers = #tpu.dot_dimension_numbers<[1], [0], [0], [1], [0, 0, 1, 1], [], []>} : vector<64x64xbf16>, vector<64x32xbf16>, vector<64x32xf32> -> vector<64x32xf32>
    %c0_3 = arith.constant 0 : index
    %c0_4 = arith.constant 0 : index
    %4 = vector.load %arg3[%c0_3, %c0_4] : memref<1x32xf32, #tpu.memory_space<vmem>>, vector<1x32xf32>
    %5 = vector.broadcast %4 : vector<1x32xf32> to vector<64x32xf32>
    %6 = arith.addf %3, %5 : vector<64x32xf32>
    %c0_5 = arith.constant 0 : index
    %c0_6 = arith.constant 0 : index
    %7 = vector.load %arg4[%c0_5, %c0_6] : memref<64x32xf32, #tpu.memory_space<vmem>>, vector<64x32xf32>
    %8 = arith.addf %6, %7 : vector<64x32xf32>
    %c0_7 = arith.constant 0 : index
    %c0_8 = arith.constant 0 : index
    %9 = vector.load %arg5[%c0_7, %c0_8] : memref<64x32xf32, #tpu.memory_space<vmem>>, vector<64x32xf32>
    tpu.vector_store %arg5[%c0_7, %c0_8], %8 {strides = array<i32>} : memref<64x32xf32, #tpu.memory_space<vmem>>, vector<64x32xf32>,
    return
  }
  func.func @transform_0(%arg0: i32) -> (i32, i32) {
    %c0_i32 = arith.constant 0 : i32
    %c0_i32_0 = arith.constant 0 : i32
    return %arg0, %c0_i32 : i32, i32
  }
  func.func @transform_1(%arg0: i32) -> (i32, i32) {
    %c0_i32 = arith.constant 0 : i32
    %c0_i32_0 = arith.constant 0 : i32
    %c0_i32_1 = arith.constant 0 : i32
    return %c0_i32, %c0_i32_0 : i32, i32
  }
  func.func @transform_2(%arg0: i32) -> (i32, i32) {
    %c0_i32 = arith.constant 0 : i32
    %c0_i32_0 = arith.constant 0 : i32
    %c0_i32_1 = arith.constant 0 : i32
    return %c0_i32, %c0_i32_0 : i32, i32
  }
  func.func @transform_3(%arg0: i32) -> (i32, i32) {
    %c0_i32 = arith.constant 0 : i32
    %c0_i32_0 = arith.constant 0 : i32
    return %arg0, %c0_i32 : i32, i32
  }
  func.func @transform_4(%arg0: i32) -> (i32, i32) {
    %c0_i32 = arith.constant 0 : i32
    %c0_i32_0 = arith.constant 0 : i32
    return %arg0, %c0_i32 : i32, i32
  }
}

</mosaic_0001>

<bundles_post_ra>
// kernel: tpu_custom_call.1
= control target key start
LH: loop header
LB: loop body
LE: loop exit
PB: predicated region body
PF: predicated region fallthrough
CT: control target
= control target key end

     0   :  { %vm69_vm0 = vcmask 523264   ;;  %vm163_vm1 = vcmask 261120   ;;  %s345_s1 = inlined_call_operand.vmem [shape: bf16[64,32], index: 1, kind: input, shape index: {}]   ;;  %s346_s0 = inlined_call_operand.vmem [shape: f32[64,64], index: 0, kind: input, shape index: {}]   ;;  %s347_s2 = inlined_call_operand.vmem [shape: f32[1,32], index: 2, kind: input, shape index: {}]   ;;  %s348_s3 = inlined_call_operand.vmem [shape: f32[64,32], index: 3, kind: input, shape index: {}]   ;;  %s349_s4 = inlined_call_operand.vmem [shape: f32[64,32], index: 4, kind: output, shape index: {}]  }
   0x1   :  { %v217_v0 = vld [vmem:[%s345_s1] sm:$0xff]   ;;  %v218_v1 = vld [vmem:[%s345_s1 + $0x8] sm:$0xff]   ;;  %v219_v2 = vld [vmem:[%s345_s1 + $0x10] sm:$0xff]  }
   0x2   :  { %193 = vmatprep.subr.bf16.mxu0 %v217_v0  ;;  %209 = vmatprep.subr.bf16.mxu1 %v217_v0  ;;  %v18_v3 = vld [vmem:[%s346_s0] sm:$0xff]  ;;  %v19_v4 = vld [vmem:[%s346_s0 + $0x8] sm:$0xff]  ;;  %v220_v9 = vld [vmem:[%s345_s1 + $0x18] sm:$0xff]  }
   0x3   :  { %194 = vmatpush3.bf16.msra.mxu0 %v217_v0  ;;  %213 = vmatpush3.bf16.msra.mxu1 %v217_v0  ;;  %v22_v5 = vld [vmem:[%s346_s0 + $0x20] sm:$0xff]  ;;  %v34_v6 = vpack.c.bf16 %v19_v4, %v18_v3  ;;  %v23_v7 = vld [vmem:[%s346_s0 + $0x28] sm:$0xff]  ;;  %v20_v10 = vld [vmem:[%s346_s0 + $0x10] sm:$0xff] }
   0x4   :  { %195 = vmatprep.subr.bf16.mxu0 %v218_v1  ;;  %210 = vmatprep.subr.bf16.mxu1 %v218_v1  ;;  %v36_v8 = vpack.c.bf16 %v23_v7, %v22_v5  ;;  %v21_v11 = vld [vmem:[%s346_s0 + $0x18] sm:$0xff]  ;;  %v24_v12 = vld [vmem:[%s346_s0 + $0x30] sm:$0xff]  ;;  %v176_v16 = vld [vmem:[%s347_s2] ss:$0 sm:$0xff] }
   0x5   :  { %201 = vmatprep.mubr.msk.bf16.mxu0 %vm69_vm0, %v34_v6  ;;  %v25_v13 = vld [vmem:[%s346_s0 + $0x38] sm:$0xff]  ;;  %v35_v14 = vpack.c.bf16 %v21_v11, %v20_v10  ;;  %v149_v18 = vld [vmem:[%s348_s3 + $0x10] sm:$0xff]  ;;  %v147_v24 = vld [vmem:[%s348_s3] sm:$0xff] }
   0x6   :  { %205 = vmatprep.mubr.msk.bf16.mxu1 %vm69_vm0, %v36_v8  ;;  %v37_v15 = vpack.c.bf16 %v25_v13, %v24_v12  ;;  %v153_v20 = vld [vmem:[%s348_s3 + $0x30] sm:$0xff]  ;;  %v151_v26 = vld [vmem:[%s348_s3 + $0x20] sm:$0xff]  ;;  %v150_v30 = vld [vmem:[%s348_s3 + $0x18] sm:$0xff] }
   0x7   :  { %196 = vmatpush3.bf16.msra.mxu0 %v218_v1  ;;  %214 = vmatpush3.bf16.msra.mxu1 %v218_v1  ;;  %v154_v32 = vld [vmem:[%s348_s3 + $0x38] sm:$0xff]  ;;  %v148_v38 = vld [vmem:[%s348_s3 + $0x8] sm:$0xff] }
   0x8   :  { %197 = vmatprep.subr.bf16.mxu0 %v219_v2  ;;  %211 = vmatprep.subr.bf16.mxu1 %v219_v2  ;;  %v152_v40 = vld [vmem:[%s348_s3 + $0x28] sm:$0xff] }
   0xb   :  { %198 = vmatpush3.bf16.msra.mxu0 %v219_v2  ;;  %215 = vmatpush3.bf16.msra.mxu1 %v219_v2 }
   0xc   :  { %199 = vmatprep.subr.bf16.mxu0 %v220_v9  ;;  %212 = vmatprep.subr.bf16.mxu1 %v220_v9 }
   0xf   :  { %200 = vmatpush3.bf16.msra.mxu0 %v220_v9  ;;  %216 = vmatpush3.bf16.msra.mxu1 %v220_v9 }
  0x12   :  { %202 = vmatmul.mubr.msk.bf16.vlgmr.msra.gmra.mrb[0].mxu0 %vm69_vm0, %v35_v14  ;;  %206 = vmatmul.mubr.msk.bf16.vlgmr.msra.gmra.mrb[0].mxu1 %vm69_vm0, %v37_v15 }
  0xe5   :  { %v203_v17 = vpop.f32.mrb[0].mxu0  ;;  %v207_v19 = vpop.f32.mrb[0].mxu1 }
  0xe6   :  { %v125_v21 = vadd.f32 %v203_v17, %v176_v16  ;;  %v141_v22 = vadd.f32 %v207_v19, %v176_v16  ;;  %v116_v23 = vpop.f32.mrb[1].mxu0  ;;  %v132_v25 = vpop.f32.mrb[1].mxu1 }
  0xe7   :  { %v117_v27 = vadd.f32 %v176_v16, %v116_v23  ;;  %v133_v28 = vadd.f32 %v176_v16, %v132_v25  ;;  %v204_v29 = vpop.f32.mrb[2].mxu0  ;;  %v208_v31 = vpop.f32.mrb[2].mxu1 }
  0xe8   :  { %v157_v33 = vadd.f32 %v149_v18, %v125_v21  ;;  %v161_v34 = vadd.f32 %v153_v20, %v141_v22  ;;  %v128_v35 = vadd.f32 %v204_v29, %v176_v16  ;;  %v144_v36 = vadd.f32 %v208_v31, %v176_v16  ;;  %v119_v37 = vpop.f32.mrb[3].mxu0  ;;  %v135_v39 = vpop.f32.mrb[3].mxu1 }
  0xe9   :  { %v155_v41 = vadd.f32 %v147_v24, %v117_v27  ;;  %v159_v42 = vadd.f32 %v151_v26, %v133_v28  ;;  %v120_v43 = vadd.f32 %v176_v16, %v119_v37  ;;  %v136_v44 = vadd.f32 %v176_v16, %v135_v39 }
  0xea   :  { %166 = vst.msk [vmem:[%s349_s4 + $0x10] sm:$0xff] %vm163_vm1, %v157_v33  ;;  %170 = vst.msk [vmem:[%s349_s4 + $0x30] sm:$0xff] %vm163_vm1, %v161_v34  ;;  %v158_v45 = vadd.f32 %v150_v30, %v128_v35  ;;  %v162_v46 = vadd.f32 %v154_v32, %v144_v36 }
  0xeb   :  { %164 = vst.msk [vmem:[%s349_s4] sm:$0xff] %vm163_vm1, %v155_v41  ;;  %168 = vst.msk [vmem:[%s349_s4 + $0x20] sm:$0xff] %vm163_vm1, %v159_v42  ;;  %v156_v47 = vadd.f32 %v148_v38, %v120_v43  ;;  %v160_v48 = vadd.f32 %v152_v40, %v136_v44 }
  0xec   :  { %167 = vst.msk [vmem:[%s349_s4 + $0x18] sm:$0xff] %vm163_vm1, %v158_v45  ;;  %171 = vst.msk [vmem:[%s349_s4 + $0x38] sm:$0xff] %vm163_vm1, %v162_v46 }
  0xed   :  { %165 = vst.msk [vmem:[%s349_s4 + $0x8] sm:$0xff] %vm163_vm1, %v156_v47  ;;  %169 = vst.msk [vmem:[%s349_s4 + $0x28] sm:$0xff] %vm163_vm1, %v160_v48 }

</bundles_post_ra>
